<compile_context>
chip_gen: v7x
topology: tpu7x:2x2x1
jax: 0.10.0
libtpu: 0.0.40
codegen_flags: <defaults>
</compile_context>

<pallas_src>
import functools

import jax
import jax.numpy as jnp
from jax import lax
from jax.experimental import pallas as pl
from jax.experimental.pallas import tpu as pltpu


def _focal_loss_kernel(logits_ref, targets_ref, out_ref, acc_ref, *,
                       gamma, alpha, n_valid, has_padding):
    p = pl.program_id(0)                       # partial-sum / megacore axis
    i = pl.program_id(1)                       # batch-tile axis ("arbitrary", reduction)
    tiles_per_part = pl.num_programs(1)

    @pl.when(i == 0)
    def _init():
        acc_ref[...] = jnp.zeros_like(acc_ref)

    logits = logits_ref[...].astype(jnp.float32)      # (C, TN) widened on the VPU
    targets = targets_ref[...]                        # (1, TN) int32
    c, tn = logits.shape

    # Numerically stable log-softmax cross-entropy (matches F.cross_entropy).
    # All per-sample temporaries are lane-dense (1, TN).
    m = jnp.max(logits, axis=0, keepdims=True)                                 # (1, TN)
    shifted = logits - m                                                       # (C, TN)
    lse_sh = jnp.log(jnp.sum(jnp.exp(shifted), axis=0, keepdims=True))         # lse - m

    # Gather the target-class logit via a one-hot compare (no dynamic gather on
    # TPU); computed from 'shifted' so m never has to be re-added / cancelled.
    class_ids = lax.broadcasted_iota(jnp.int32, (c, tn), 0)                    # (C, TN)
    picked_sh = jnp.sum(jnp.where(class_ids == targets, shifted, 0.0),
                        axis=0, keepdims=True)                                 # picked - m

    # ce = lse - picked = lse_sh - picked_sh (m cancels exactly).  The clamp
    # guards the pt > 1 (=> 1 - pt < 0) edge case from f32 cancellation; it
    # can differ from PyTorch at the ~1e-7 level (benign).
    ce = jnp.maximum(lse_sh - picked_sh, 0.0)                                  # (1, TN)
    pt = jnp.exp(-ce)
    one_m_pt = 1.0 - pt

    g = float(gamma)
    if g == 2.0:
        mod = one_m_pt * one_m_pt            # single VPU mul, no EUP pow, NaN-safe
    elif g == int(g) and g >= 0.0:
        mod = jnp.ones_like(one_m_pt)
        for _ in range(int(g)):              # small integer exponent: repeated multiply
            mod = mod * one_m_pt
    else:
        mod = jnp.power(jnp.maximum(one_m_pt, 0.0), g)   # non-integer gamma fallback
    focal = alpha * (mod * ce)                                                 # (1, TN)

    # Accumulate with a plain VPU add into the lane-dense accumulator; the
    # batch-padding mask is only materialized on tiles that can contain
    # padding (and is skipped entirely at trace time when there is none).
    if has_padding:
        tile_idx = p * tiles_per_part + i
        tile_end = (tile_idx + 1) * tn

        @pl.when(tile_end <= n_valid)
        def _acc_full():
            acc_ref[...] += focal

        @pl.when(tile_end > n_valid)
        def _acc_masked():
            col_ids = tile_idx * tn + lax.broadcasted_iota(jnp.int32, (1, tn), 1)
            acc_ref[...] += jnp.where(col_ids < n_valid, focal, 0.0)
    else:
        acc_ref[...] += focal

    @pl.when(i == tiles_per_part - 1)
    def _finalize():
        # Single cross-lane reduce per partial; write the whole lane-dense
        # (8,128) output block (unmasked vst).  The wrapper reads [0, 0] of
        # each partial-sum block.
        out_ref[...] = jnp.full(out_ref.shape, jnp.sum(acc_ref[...]),
                                dtype=jnp.float32)


def _round_up(x, m):
    return ((x + m - 1) // m) * m


def _vmem_capacity_bytes():
    """Best-effort physical VMEM query; conservative (v7x per-TC) fallback."""
    try:
        info = pltpu.get_tpu_info()
        cap = getattr(info, "vmem_capacity_bytes", None)
        if cap:
            return int(cap)
    except Exception:
        pass
    return 64 * 1024 * 1024


def _choose_tile_cols(n, c, itemsize, vmem_budget_bytes,
                      target_dma_bytes=4 * 1024 * 1024):
    """Pick the lane-axis (batch) tile width, a multiple of 128.

    Sized so each grid step moves multi-MiB of *real* HBM bytes (per-step
    overhead ~0.35us makes tiny steps roofline-hostile), while the VMEM
    footprint — accounted with the sublane-padded (C, TN) block plus the
    in-kernel f32 widen / exp temporaries (mandatory on v5e: no bf16 VPU/EUP)
    and double-buffered native-dtype inputs — stays inside the budget.
    """
    c_pad = max(8, _round_up(c, 8))
    # Real HBM bytes per batch column: logits row + 4B target.
    bytes_per_col_hbm = c * itemsize + 4
    tn_dma = target_dma_bytes // max(bytes_per_col_hbm, 1)
    # VMEM bytes per batch column:
    #   2x double-buffered native-dtype logits block
    #   + f32 widen + exp(shifted) + one spare f32-wide temporary
    #   + double-buffered targets block (padded to 8 sublanes)
    #   + lane-dense f32 accumulator (padded to 8 sublanes)
    bytes_per_col_vmem = (2 * c_pad * itemsize + 3 * c_pad * 4
                          + 2 * 8 * 4 + 8 * 4)
    tn_vmem = vmem_budget_bytes // max(bytes_per_col_vmem, 1)
    tn = max(128, min(tn_dma, tn_vmem))
    tn = (tn // 128) * 128
    n_rounded = max(128, _round_up(n, 128))
    return min(tn, n_rounded)


def focal_loss(logits, targets, gamma=2.0, alpha=0.25,
               tile_batch=None, num_partials=None, core_parallel=False):
    """logits: (N, C) float (any dtype), targets: (N,) int — returns scalar f32."""
    n, c = logits.shape
    itemsize = jnp.dtype(logits.dtype).itemsize

    # Generation-aware VMEM: ~3/4 of a v7x TensorCore's 64 MiB, up to 96 MiB
    # on v5e/v6e (128 MiB physical).  Half of the limit is handed to the tile
    # chooser so double-buffered inputs + compute temporaries keep headroom.
    vmem_cap = _vmem_capacity_bytes()
    vmem_limit = (48 * 1024 * 1024 if vmem_cap <= 64 * 1024 * 1024
                  else 96 * 1024 * 1024)

    if tile_batch is None:
        tn = _choose_tile_cols(n, c, itemsize, vmem_limit // 2)
    else:
        tn = int(tile_batch)
    assert tn % 128 == 0, "tile_batch must be a multiple of 128 (lane tiling)"

    total_tiles = pl.cdiv(n, tn)
    if num_partials is None:
        # Split across 2 partial sums when there is enough work (megacore /
        # v7x 2-TC sharding of the leading grid axis); otherwise keep 1.
        num_partials = 2 if total_tiles >= 4 else 1
    tiles_per_part = pl.cdiv(total_tiles, num_partials)
    n_padded = tiles_per_part * num_partials * tn

    # Lane-dense layout: classes on sublanes, batch on the 128-lane axis.
    # Native-dtype logits go straight to DMA; the f32 widen happens in-kernel.
    logits_t = jnp.transpose(logits)                       # (C, N)
    targets_row = targets.astype(jnp.int32).reshape(1, n)  # (1, N)
    if n_padded != n:
        logits_t = jnp.pad(logits_t, ((0, 0), (0, n_padded - n)))
        targets_row = jnp.pad(targets_row, ((0, 0), (0, n_padded - n)))

    kernel = functools.partial(
        _focal_loss_kernel, gamma=float(gamma), alpha=float(alpha),
        n_valid=n, has_padding=(n_padded != n))

    # On v7x, core_parallel=True requests CORE_PARALLEL on the partial axis so
    # the reduction is actually sharded across the two TensorCores (plain
    # "parallel" has near-zero codegen impact).  Off by default for v5e/v6e.
    first_axis_sem = pltpu.CORE_PARALLEL if core_parallel else pltpu.PARALLEL

    out = pl.pallas_call(
        kernel,
        out_shape=jax.ShapeDtypeStruct((num_partials * 8, 128), jnp.float32),
        grid_spec=pltpu.PrefetchScalarGridSpec(
            num_scalar_prefetch=0,
            grid=(num_partials, tiles_per_part),
            in_specs=[
                pl.BlockSpec((c, tn), lambda p, i: (0, p * tiles_per_part + i)),
                pl.BlockSpec((1, tn), lambda p, i: (0, p * tiles_per_part + i)),
            ],
            out_specs=pl.BlockSpec((8, 128), lambda p, i: (p, 0)),
            scratch_shapes=[pltpu.VMEM((1, tn), jnp.float32)],
        ),
        compiler_params=pltpu.CompilerParams(
            dimension_semantics=(first_axis_sem, pltpu.ARBITRARY),
            vmem_limit_bytes=vmem_limit,
        ),
    )(logits_t, targets_row)

    partials = out[0::8, 0]                            # (num_partials,) partial sums
    return jnp.sum(partials) * jnp.float32(1.0 / n)    # single multiply by 1/N


def _focal_loss_ref(logits, targets, gamma=2.0, alpha=0.25):
    # Pure-JAX reference for correctness checking.
    logp = jax.nn.log_softmax(logits.astype(jnp.float32), axis=-1)
    ce = -jnp.take_along_axis(logp, targets[:, None].astype(jnp.int32), axis=-1)[:, 0]
    pt = jnp.exp(-ce)
    return jnp.mean(alpha * (1.0 - pt) ** gamma * ce)


if __name__ == "__main__":
    key = jax.random.PRNGKey(0)
    k1, k2, k3, k4, k5, k6 = jax.random.split(key, 6)

    # 1) Small shape implied by the module (classification head): batch x classes.
    N, C = 8, 16
    logits = jax.random.normal(k1, (N, C), dtype=jnp.float32)
    targets = jax.random.randint(k2, (N,), 0, C, dtype=jnp.int32)
    loss = focal_loss(logits, targets, gamma=2.0, alpha=0.25)
    jax.block_until_ready(loss)
    ref = _focal_loss_ref(logits, targets, gamma=2.0, alpha=0.25)
    assert jnp.allclose(loss, ref, atol=1e-5, rtol=1e-5), (loss, ref)

    # 2) Tiled / multi-partial path: multiple tiles per partial, both the
    #    unmasked and the padding-masked accumulate branches, two partial sums.
    N2, C2 = 300, 16
    logits2 = jax.random.normal(k3, (N2, C2), dtype=jnp.float32)
    targets2 = jax.random.randint(k4, (N2,), 0, C2, dtype=jnp.int32)
    loss2 = focal_loss(logits2, targets2, tile_batch=128, num_partials=2)
    jax.block_until_ready(loss2)
    ref2 = _focal_loss_ref(logits2, targets2)
    assert jnp.allclose(loss2, ref2, atol=1e-5, rtol=1e-5), (loss2, ref2)

    # 3) Auto-chosen tile, bf16 inputs (native-dtype DMA + in-kernel widen),
    #    no-padding trace path.
    N3, C3 = 640, 16
    logits3 = jax.random.normal(k5, (N3, C3), dtype=jnp.bfloat16)
    targets3 = jax.random.randint(k6, (N3,), 0, C3, dtype=jnp.int32)
    loss3 = focal_loss(logits3, targets3)
    jax.block_until_ready(loss3)
    ref3 = _focal_loss_ref(logits3, targets3)
    assert jnp.allclose(loss3, ref3, atol=1e-4, rtol=1e-4), (loss3, ref3)

    print("KERNEL_OK")
</pallas_src>

<mosaic_0001>
module attributes {stable_mosaic.version = 11 : i64} {
  func.func @_focal_loss_kernel(%arg0: i32, %arg1: i32, %arg2: memref<16x128xf32, #tpu.memory_space<vmem>>, %arg3: memref<1x128xi32, #tpu.memory_space<vmem>>, %arg4: memref<8x128xf32, #tpu.memory_space<vmem>>, %arg5: memref<1x128xf32, #tpu.memory_space<vmem>>) attributes {dimension_semantics = [#tpu.dimension_semantics<parallel>, #tpu.dimension_semantics<arbitrary>], iteration_bounds = array<i64: 1, 1>, scalar_prefetch = 0 : i64, scratch_operands = 1 : i64, tpu.core_type = #tpu.core_type<tc>, window_params = [{transform_indices = @transform_0, window_bounds = array<i64: 16, 128>}, {transform_indices = @transform_1, window_bounds = array<i64: 1, 128>}, {transform_indices = @transform_2, window_bounds = array<i64: 8, 128>}]} {
    %c0_i32 = arith.constant 0 : i32
    %0 = arith.cmpi eq, %arg1, %c0_i32 : i32
    %1 = arith.extui %0 : i1 to i32
    %c0_i32_0 = arith.constant 0 : i32
    %2 = arith.cmpi ne, %1, %c0_i32_0 : i32
    scf.if %2 {
      %cst_17 = arith.constant 0.000000e+00 : f32
      %45 = vector.broadcast %cst_17 : f32 to vector<1x128xf32>
      %c0_18 = arith.constant 0 : index
      %c0_19 = arith.constant 0 : index
      %46 = vector.load %arg5[%c0_18, %c0_19] : memref<1x128xf32, #tpu.memory_space<vmem>>, vector<1x128xf32>
      tpu.vector_store %arg5[%c0_18, %c0_19], %45 {strides = array<i32>} : memref<1x128xf32, #tpu.memory_space<vmem>>, vector<1x128xf32>,
    } else {
    }
    %c0 = arith.constant 0 : index
    %c0_1 = arith.constant 0 : index
    %3 = vector.load %arg2[%c0, %c0_1] : memref<16x128xf32, #tpu.memory_space<vmem>>, vector<16x128xf32>
    %c0_2 = arith.constant 0 : index
    %c0_3 = arith.constant 0 : index
    %4 = vector.load %arg3[%c0_2, %c0_3] : memref<1x128xi32, #tpu.memory_space<vmem>>, vector<1x128xi32>
    %cst = arith.constant dense<0xFF800000> : vector<128xf32>
    %5 = vector.multi_reduction <maximumf>, %3, %cst [0] : vector<16x128xf32> to vector<128xf32>
    %6 = vector.shape_cast %5 : vector<128xf32> to vector<1x128xf32>
    %7 = vector.broadcast %6 : vector<1x128xf32> to vector<16x128xf32>
    %8 = arith.subf %3, %7 : vector<16x128xf32>
    %9 = math.exp %8 : vector<16x128xf32>
    %cst_4 = arith.constant dense<0.000000e+00> : vector<128xf32>
    %10 = vector.multi_reduction <add>, %9, %cst_4 [0] : vector<16x128xf32> to vector<128xf32>
    %11 = vector.shape_cast %10 : vector<128xf32> to vector<1x128xf32>
    %12 = math.log %11 : vector<1x128xf32>
    %13 = tpu.iota {dimensions = array<i32: 0>} : vector<16x128xi32>
    %14 = vector.broadcast %4 : vector<1x128xi32> to vector<16x128xi32>
    %15 = arith.cmpi eq, %13, %14 : vector<16x128xi32>
    %cst_5 = arith.constant 0.000000e+00 : f32
    %16 = vector.broadcast %cst_5 : f32 to vector<16x128xf32>
    %17 = arith.select %15, %8, %16 : vector<16x128xi1>, vector<16x128xf32>
    %cst_6 = arith.constant dense<0.000000e+00> : vector<128xf32>
    %18 = vector.multi_reduction <add>, %17, %cst_6 [0] : vector<16x128xf32> to vector<128xf32>
    %19 = vector.shape_cast %18 : vector<128xf32> to vector<1x128xf32>
    %20 = arith.subf %12, %19 : vector<1x128xf32>
    %cst_7 = arith.constant 0.000000e+00 : f32
    %21 = vector.broadcast %cst_7 : f32 to vector<1x128xf32>
    %22 = arith.maximumf %20, %21 : vector<1x128xf32>
    %cst_8 = arith.constant 0.000000e+00 : f32
    %23 = vector.broadcast %cst_8 : f32 to vector<1x128xf32>
    %24 = arith.subf %23, %22 : vector<1x128xf32>
    %25 = math.exp %24 : vector<1x128xf32>
    %cst_9 = arith.constant 1.000000e+00 : f32
    %26 = vector.broadcast %cst_9 : f32 to vector<1x128xf32>
    %27 = arith.subf %26, %25 : vector<1x128xf32>
    %28 = arith.mulf %27, %27 : vector<1x128xf32>
    %29 = arith.mulf %28, %22 : vector<1x128xf32>
    %cst_10 = arith.constant 2.500000e-01 : f32
    %30 = vector.broadcast %cst_10 : f32 to vector<1x128xf32>
    %31 = arith.mulf %30, %29 : vector<1x128xf32>
    %c1_i32 = arith.constant 1 : i32
    %32 = arith.muli %arg0, %c1_i32 : i32
    %33 = arith.addi %32, %arg1 : i32
    %c1_i32_11 = arith.constant 1 : i32
    %34 = arith.addi %33, %c1_i32_11 : i32
    %c128_i32 = arith.constant 128 : i32
    %35 = arith.muli %34, %c128_i32 : i32
    %c8_i32 = arith.constant 8 : i32
    %36 = arith.cmpi sle, %35, %c8_i32 : i32
    %37 = arith.extui %36 : i1 to i32
    %c0_i32_12 = arith.constant 0 : i32
    %38 = arith.cmpi ne, %37, %c0_i32_12 : i32
    scf.if %38 {
      %c0_17 = arith.constant 0 : index
      %c0_18 = arith.constant 0 : index
      %45 = vector.load %arg5[%c0_17, %c0_18] : memref<1x128xf32, #tpu.memory_space<vmem>>, vector<1x128xf32>
      %46 = arith.addf %45, %31 : vector<1x128xf32>
      %c0_19 = arith.constant 0 : index
      %c0_20 = arith.constant 0 : index
      %47 = vector.load %arg5[%c0_19, %c0_20] : memref<1x128xf32, #tpu.memory_space<vmem>>, vector<1x128xf32>
      tpu.vector_store %arg5[%c0_19, %c0_20], %46 {strides = array<i32>} : memref<1x128xf32, #tpu.memory_space<vmem>>, vector<1x128xf32>,
    } else {
    }
    %c8_i32_13 = arith.constant 8 : i32
    %39 = arith.cmpi sgt, %35, %c8_i32_13 : i32
    %40 = arith.extui %39 : i1 to i32
    %c0_i32_14 = arith.constant 0 : i32
    %41 = arith.cmpi ne, %40, %c0_i32_14 : i32
    scf.if %41 {
      %c128_i32_17 = arith.constant 128 : i32
      %45 = arith.muli %33, %c128_i32_17 : i32
      %46 = tpu.iota {dimensions = array<i32: 1>} : vector<1x128xi32>
      %47 = vector.broadcast %45 : i32 to vector<1x128xi32>
      %48 = arith.addi %47, %46 : vector<1x128xi32>
      %c0_18 = arith.constant 0 : index
      %c0_19 = arith.constant 0 : index
      %49 = vector.load %arg5[%c0_18, %c0_19] : memref<1x128xf32, #tpu.memory_space<vmem>>, vector<1x128xf32>
      %c8_i32_20 = arith.constant 8 : i32
      %50 = vector.broadcast %c8_i32_20 : i32 to vector<1x128xi32>
      %51 = arith.cmpi slt, %48, %50 : vector<1x128xi32>
      %cst_21 = arith.constant 0.000000e+00 : f32
      %52 = vector.broadcast %cst_21 : f32 to vector<1x128xf32>
      %53 = arith.select %51, %31, %52 : vector<1x128xi1>, vector<1x128xf32>
      %54 = arith.addf %49, %53 : vector<1x128xf32>
      %c0_22 = arith.constant 0 : index
      %c0_23 = arith.constant 0 : index
      %55 = vector.load %arg5[%c0_22, %c0_23] : memref<1x128xf32, #tpu.memory_space<vmem>>, vector<1x128xf32>
      tpu.vector_store %arg5[%c0_22, %c0_23], %54 {strides = array<i32>} : memref<1x128xf32, #tpu.memory_space<vmem>>, vector<1x128xf32>,
    } else {
    }
    %c0_i32_15 = arith.constant 0 : i32
    %42 = arith.cmpi eq, %arg1, %c0_i32_15 : i32
    %43 = arith.extui %42 : i1 to i32
    %c0_i32_16 = arith.constant 0 : i32
    %44 = arith.cmpi ne, %43, %c0_i32_16 : i32
    scf.if %44 {
      %c0_17 = arith.constant 0 : index
      %c0_18 = arith.constant 0 : index
      %45 = vector.load %arg5[%c0_17, %c0_18] : memref<1x128xf32, #tpu.memory_space<vmem>>, vector<1x128xf32>
      %46 = vector.shape_cast %45 : vector<1x128xf32> to vector<1x1x128xf32>
      %cst_19 = arith.constant dense<0.000000e+00> : vector<1xf32>
      %47 = vector.multi_reduction <add>, %46, %cst_19 [1, 2] : vector<1x1x128xf32> to vector<1xf32>
      %48 = vector.shape_cast %47 : vector<1xf32> to vector<1x1x1xf32>
      %49 = vector.extract %48[0, 0, 0] : f32 from vector<1x1x1xf32>
      %50 = vector.broadcast %49 : f32 to vector<8x128xf32>
      %c0_20 = arith.constant 0 : index
      %c0_21 = arith.constant 0 : index
      %51 = vector.load %arg4[%c0_20, %c0_21] : memref<8x128xf32, #tpu.memory_space<vmem>>, vector<8x128xf32>
      tpu.vector_store %arg4[%c0_20, %c0_21], %50 {strides = array<i32>} : memref<8x128xf32, #tpu.memory_space<vmem>>, vector<8x128xf32>,
    } else {
    }
    return
  }
  func.func @transform_0(%arg0: i32, %arg1: i32) -> (i32, i32) {
    %c1_i32 = arith.constant 1 : i32
    %0 = arith.muli %arg0, %c1_i32 : i32
    %1 = arith.addi %0, %arg1 : i32
    %c0_i32 = arith.constant 0 : i32
    %c0_i32_0 = arith.constant 0 : i32
    return %c0_i32, %1 : i32, i32
  }
  func.func @transform_1(%arg0: i32, %arg1: i32) -> (i32, i32) {
    %c1_i32 = arith.constant 1 : i32
    %0 = arith.muli %arg0, %c1_i32 : i32
    %1 = arith.addi %0, %arg1 : i32
    %c0_i32 = arith.constant 0 : i32
    %c0_i32_0 = arith.constant 0 : i32
    return %c0_i32, %1 : i32, i32
  }
  func.func @transform_2(%arg0: i32, %arg1: i32) -> (i32, i32) {
    %c0_i32 = arith.constant 0 : i32
    %c0_i32_0 = arith.constant 0 : i32
    return %arg0, %c0_i32 : i32, i32
  }
}

</mosaic_0001>

<bundles_post_ra>
// kernel: tpu_custom_call.1
= control target key start
LH: loop header
LB: loop body
LE: loop exit
PB: predicated region body
PF: predicated region fallthrough
CT: control target
= control target key end

     0   :  { %7 = vsyncpa [#allocation4], 0  ;;  %s271_s0 = inlined_call_operand.hbm [shape: f32[16,128], index: 0, kind: input, shape index: {}]   ;;  %s272_s1 = inlined_call_operand.vmem [shape: s32[1,128], index: 1, kind: input, shape index: {}]   ;;  %s273_s2 = inlined_call_operand.hbm [shape: f32[8,128], index: 2, kind: output, shape index: {}]  }
   0x1   :  { %8 = vsyncpa [#allocation5], 0  ;;  %s224_s9 = smov [#allocation3]   ;;  %s176_s13 = scalar_lea.hbm %s271_s0, 256 }
   0x2   :  { %s17_s10 = sshll.u32 %s224_s9, 4  ;;  %p177_p0 = scmp.ne.s32.totalorder %s271_s0, %s176_s13  ;;  %s18_s10 = int_to_ptr.vmem [resolvable:$true] %s17_s10 }
   0x3   :  { %p180_p1 = scmp.lt.u32.totalorder %s176_s13, %s271_s0 }
   0x5   :  { %p182_p2 = pnand %p180_p1, %p177_p0 }
   0x7   :  { %185 = shalt.err (!%p182_p2)
}
   0x8   :  { %s186_s18 = scalar_lea.vmem %s18_s10, 256  ;;  %p191_p4 = scmp.lt.s32.totalorder %s18_s10, %s18_s10 }
   0x9   :  { %p187_p3 = scmp.ne.s32.totalorder %s18_s10, %s186_s18  ;;  %p192_p5 = scmp.lt.s32.totalorder %s186_s18, %s186_s18 }
   0xb   :  { %p193_p6 = por %p192_p5, %p191_p4 }
   0xd   :  { %p194_p7 = pnand %p193_p6, %p187_p3 }
   0xf   :  { %197 = shalt.err (!%p194_p7)
}
  0x10   :  { %s225_s19 = smov 128   ;;  %s226_s20 = smov 8  }
  0x11   :  { %23 = dma.hbm_to_vmem [thread:$0]  %s271_s0, 256, %s18_s10, [#allocation4], %s225_s19, %s225_s19, %s226_s20  }
  0x12   :  { %220 = dma.done.wait [#allocation4], 256  }
  0x13   :  { %221 = vsyncadd [#allocation4], 4294967040  ;;  %v227_v0 = vmov 0.0   ;;  %v49_v1 = vld [vmem:[#allocation3] sm:$0xff]  ;;  %v50_v2 = vld [vmem:[#allocation3 + $0x8] sm:$0xff]  ;;  %v74_v9 = vlaneseq  ;;  %vm129_vm3 = vcmask 1040384  }
  0x14   :  { %48 = vst [vmem:[#allocation2] sm:$0x1] %v227_v0  ;;  %v52_v3 = vmax.f32 %v49_v1, %v50_v2  ;;  %v160_v17 = vld [vmem:[%s272_s1] ss:$0 sm:$0xff]  ;;  %s228_s1 = smov [#allocation6]  }
  0x15   :  { %v75_v13 = vshrl.u32 %v74_v9, 7  ;;  %v117_v44 = vand.u32 127, %v74_v9  ;;  %s148_s24 = sshll.u32 %s228_s1, 4  ;;  %s149_s24 = int_to_ptr.vmem [resolvable:$true] %s148_s24 }
  0x16   :  { %v53_v4 = vrot.slane %v52_v3, 4  ;;  %s198_s26 = scalar_lea.vmem %s149_s24, 128  ;;  %p203_p9 = scmp.lt.s32.totalorder %s149_s24, %s149_s24 }
  0x17   :  { %v76_v16 = vadd.s32 8, %v75_v13  ;;  %vm81_vm0 = vcmp.eq.s32.totalorder %v75_v13, %v160_v17  ;;  %vm121_vm2 = vcmp.lt.s32.totalorder %v117_v44, 8  ;;  %p199_p8 = scmp.ne.s32.totalorder %s149_s24, %s198_s26  ;;  %p204_p10 = scmp.lt.s32.totalorder %s198_s26, %s198_s26 }
  0x18   :  { %v54_v5 = vmax.f32 %v52_v3, %v53_v4 }
  0x19   :  { %vm82_vm1 = vcmp.eq.s32.totalorder %v76_v16, %v160_v17  ;;  %p205_p11 = por %p204_p10, %p203_p9 }
  0x1a   :  { %v55_v6 = vrot.slane %v54_v5, 2 }
  0x1b   :  { %v120_v48 = vld [vmem:[#allocation2] sm:$0x1]  ;;  %p206_p12 = pnand %p205_p11, %p199_p8 }
  0x1c   :  { %v56_v7 = vmax.f32 %v54_v5, %v55_v6 }
  0x1e   :  { %v57_v8 = vrot.slane %v56_v7, 1 }
  0x20   :  { %v58_v10 = vmax.f32 %v56_v7, %v57_v8 }
  0x22   :  { %v59_v11 = vsub.f32 %v49_v1, %v58_v10  ;;  %v60_v12 = vsub.f32 %v50_v2, %v58_v10 }
  0x24   :  { %v61_v14 = vmul.f32 1.442695, %v59_v11  ;;  %v63_v15 = vmul.f32 1.442695, %v60_v12  ;;  %v83_v18 = vsel %vm81_vm0, %v59_v11, 0.0  ;;  %v84_v19 = vsel %vm82_vm1, %v60_v12, 0.0 }
  0x25   :  { %v85_v22 = vadd.f32 %v84_v19, %v83_v18 }
  0x26   :  { %168 = vpow2.f32 %v61_v14 }
  0x27   :  { %170 = vpow2.f32 %v63_v15  ;;  %v86_v25 = vrot.slane %v85_v22, 4 }
  0x29   :  { %v87_v28 = vadd.f32 %v86_v25, %v85_v22 }
  0x2b   :  { %v88_v31 = vrot.slane %v87_v28, 2 }
  0x2d   :  { %v89_v33 = vadd.f32 %v88_v31, %v87_v28 }
  0x2f   :  { %v90_v34 = vrot.slane %v89_v33, 1 }
  0x30   :  { %v169_v20 = vpop.eup %168 }
  0x31   :  { %v171_v21 = vpop.eup %170  ;;  %v91_v35 = vadd.f32 %v90_v34, %v89_v33 }
  0x32   :  { %v65_v23 = vadd.f32 %v171_v21, %v169_v20 }
  0x34   :  { %v66_v24 = vrot.slane %v65_v23, 4 }
  0x36   :  { %v67_v26 = vadd.f32 %v66_v24, %v65_v23 }
  0x38   :  { %v68_v27 = vrot.slane %v67_v26, 2 }
  0x3a   :  { %v69_v29 = vadd.f32 %v68_v27, %v67_v26 }
  0x3c   :  { %v70_v30 = vrot.slane %v69_v29, 1 }
  0x3e   :  { %v71_v32 = vadd.f32 %v70_v30, %v69_v29 }
  0x40   :  { %172 = vlog2.f32 %v71_v32 }
  0x4a   :  { %v173_v36 = vpop.eup %172 }
  0x4b   :  { %v73_v37 = vmul.f32 0.6931472, %v173_v36 }
  0x4d   :  { %v92_v38 = vsub.f32 %v73_v37, %v91_v35 }
  0x4f   :  { %v93_v39 = vmax.f32 %v92_v38, 0.0 }
  0x51   :  { %v94_v40 = vsub.f32 0.0, %v93_v39 }
  0x53   :  { %v95_v41 = vmul.f32 1.442695, %v94_v40 }
  0x55   :  { %174 = vpow2.f32 %v95_v41 }
  0x5f   :  { %v175_v42 = vpop.eup %174 }
  0x60   :  { %v97_v43 = vsub.f32 1.0, %v175_v42 }
  0x62   :  { %v98_v45 = vmul.f32 %v97_v43, %v97_v43 }
  0x64   :  { %v99_v46 = vmul.f32 %v98_v45, %v93_v39 }
  0x66   :  { %v100_v47 = vmul.f32 0.25, %v99_v46 }
  0x68   :  { %v122_v49 = vsel %vm121_vm2, %v100_v47, 0.0 }
  0x69   :  { %v123_v50 = vadd.f32 %v122_v49, %v120_v48 }
  0x6b   :  { %124 = vst [vmem:[#allocation2] sm:$0x1] %v123_v50 }
  0x72   :  { %v128_v51 = vld [vmem:[#allocation2] sm:$0x1] }
  0x73   :  { %v130_v52 = vsel %vm129_vm3, %v128_v51, 0.0 }
  0x74   :  { %131 = vadd.xlane.f32.xlu0 %v130_v52 }
 0x101   :  { %v132_v53 = vpop.xlane.xlu0 %131 }
 0x102   :  { %v133_v54 = vrot.slane %v132_v53, 4 }
 0x104   :  { %v134_v55 = vadd.f32 %v133_v54, %v132_v53 }
 0x106   :  { %v135_v56 = vrot.slane %v134_v55, 2 }
 0x108   :  { %v136_v57 = vadd.f32 %v135_v56, %v134_v55 }
 0x10a   :  { %v137_v58 = vrot.slane %v136_v57, 1 }
 0x10c   :  { %v138_v59 = vadd.f32 %v137_v58, %v136_v57 }
 0x10e   :  { %161 = vpush %v138_v59 }
 0x13f   :  { %s162_s25 = spop %161 }
 0x140   :  { %v140_v60 = vstv %s162_s25 }
 0x141   :  { %141 = vst [vmem:[#allocation6] sm:$0xff] %v140_v60 }
 0x142   :  { %209 = shalt.err (!%p206_p12)
}
 0x143   :  { %s210_s29 = scalar_lea.hbm %s273_s2, 128 }
 0x144   :  { %p211_p13 = scmp.ne.s32.totalorder %s273_s2, %s210_s29  ;;  %p214_p0 = scmp.lt.u32.totalorder %s210_s29, %s273_s2 }
 0x146   :  { %p216_p1 = pnand %p214_p0, %p211_p13 }
 0x148   :  { %219 = shalt.err (!%p216_p1)
}
 0x149   :  { %151 = dma.vmem_to_hbm [thread:$0]  %s149_s24, 128, %s273_s2, [#allocation5]  }
 0x14a   :  { %222 = dma.done.wait [#allocation5], 128  }
 0x14b   :  { %223 = vsyncadd [#allocation5], 4294967168 }
 0x14c   :  { %155 = vsyncpa [#allocation4], 1 }
 0x14d   :  { %156 = vsyncpa [#allocation5], 1 }

</bundles_post_ra>
